<compile_context>
chip_gen: v7x
topology: tpu7x:2x2x1
jax: 0.10.0
libtpu: 0.0.40
codegen_flags: <defaults>
</compile_context>

<pallas_src>
import functools
import math

import jax
import jax.numpy as jnp
from jax.experimental import pallas as pl
from jax.experimental.pallas import tpu as pltpu


def _soft_masked_conv_kernel(temp_ref, x_ref, w_ref, mw_ref, o_ref, wmat_ref, *,
                             K, block_h, W_out, stride, scaling, ticket, cin):
    """Grid point (n, r): conv of `block_h` output rows of batch element n."""
    # ---- masked weight: compute once per batch element (at row-tile 0) ---------
    @pl.when(pl.program_id(1) == 0)
    def _():
        w = w_ref[...]                                   # (K*K*Cin, Cout_pad) f32
        mw = mw_ref[...]
        if ticket:
            mask = (mw > 0.0).astype(jnp.float32)
        else:
            mask = jax.nn.sigmoid(temp_ref[0] * mw)      # EUP sigmoid
        wmat_ref[...] = (w * (scaling * mask)).astype(jnp.bfloat16)

    # ---- im2col over this row tile ----------------------------------------------
    r = pl.program_id(1)
    th_in = stride * (block_h - 1) + K                   # input rows needed
    row0 = pl.multiple_of(r * (block_h * stride), block_h * stride)
    # (1, th_in, Wp, Cin); cast once to bf16 so all tap shuffling moves half the bits.
    xv = x_ref[:, pl.ds(row0, th_in), :, :].astype(jnp.bfloat16)

    taps = []
    for kh in range(K):
        for kw in range(K):
            if stride == 1:
                sl = xv[:, kh:kh + block_h, kw:kw + W_out, :]
            else:
                # strided slicing only on H (dim 1) / W (sublane) dims, never lanes.
                sl = jax.lax.slice(
                    xv, (0, kh, kw, 0),
                    (1, kh + stride * (block_h - 1) + 1,
                     kw + stride * (W_out - 1) + 1, cin),
                    (1, stride, stride, 1))
            taps.append(sl)                              # (1, block_h, W_out, Cin)
    patch = jnp.concatenate(taps, axis=-1)               # (1, block_h, W_out, K*K*Cin)
    patch = patch.reshape(block_h * W_out, K * K * cin)

    # ---- single MXU matmul (contraction = K*K*Cin), f32 accumulation ------------
    acc = jnp.dot(patch, wmat_ref[...], preferred_element_type=jnp.float32)
    o_ref[...] = acc.reshape(o_ref.shape)                # lane-dense Cout_pad store


def _snap_block_h(h_out, w_out):
    """Largest divisor of h_out giving ~<=512 patch rows per tile."""
    target = max(1, min(h_out, 512 // max(w_out, 1)))
    for d in range(target, 0, -1):
        if h_out % d == 0:
            return d
    return 1


def soft_masked_conv2d(x_nchw, weight_oihw, mask_weight_oihw, *,
                       temp=1.0, ticket=False, stride=1, padding=1,
                       mask_initial_value=0.0, block_h=None):
    """Matches SoftMaskedConv2d.forward(x, temp, ticket); NCHW / OIHW in & out."""
    x_nchw = jnp.asarray(x_nchw, jnp.float32)
    weight_oihw = jnp.asarray(weight_oihw, jnp.float32)
    mask_weight_oihw = jnp.asarray(mask_weight_oihw, jnp.float32)

    N, Cin, H, W = x_nchw.shape
    Cout, _, K, _ = weight_oihw.shape
    H_out = (H + 2 * padding - K) // stride + 1
    W_out = (W + 2 * padding - K) // stride + 1

    if block_h is None:
        block_h = _snap_block_h(H_out, W_out)
    else:
        block_h = max(1, min(block_h, H_out))
        while H_out % block_h:
            block_h -= 1

    # Layout glue (outside the hot path): NCHW->NHWC, OIHW->(K*K*Cin, Cout_pad).
    x_nhwc = jnp.transpose(x_nchw, (0, 2, 3, 1))
    x_pad = jnp.pad(x_nhwc, ((0, 0), (padding, padding), (padding, padding), (0, 0)))
    # TODO(synk): the zero halo is still a separate XLA pad op; folding it into the
    # kernel's DMA (guarded edge loads) would save one full HBM pass over x.
    Hp, Wp = H + 2 * padding, W + 2 * padding

    kkc = K * K * Cin
    cout_pad = ((Cout + 127) // 128) * 128
    w_mat = jnp.transpose(weight_oihw, (2, 3, 1, 0)).reshape(kkc, Cout)
    mw_mat = jnp.transpose(mask_weight_oihw, (2, 3, 1, 0)).reshape(kkc, Cout)
    w_mat = jnp.pad(w_mat, ((0, 0), (0, cout_pad - Cout)))    # zero weight => zero out
    mw_mat = jnp.pad(mw_mat, ((0, 0), (0, cout_pad - Cout)))

    scaling = float(1.0 + math.exp(-mask_initial_value))       # 1 / sigmoid(miv)
    temp_arr = jnp.asarray([temp], jnp.float32)

    kernel = functools.partial(
        _soft_masked_conv_kernel,
        K=K, block_h=block_h, W_out=W_out, stride=stride,
        scaling=scaling, ticket=bool(ticket), cin=Cin)

    grid = (N, H_out // block_h)

    # VMEM budget (double-buffered blocks) -> explicit limit, v7x-safe (<= 64 MiB).
    est = (2 * Hp * Wp * Cin * 4 + 2 * block_h * W_out * cout_pad * 4
           + 4 * kkc * cout_pad * 4 + kkc * cout_pad * 2)
    vmem_limit = int(min(64 * 2 ** 20, max(32 * 2 ** 20, 4 * est)))

    cost = pl.CostEstimate(
        flops=2 * N * H_out * W_out * K * K * Cin * Cout,
        transcendentals=0 if ticket else kkc * Cout,
        bytes_accessed=int((x_pad.size + w_mat.size + mw_mat.size
                            + N * H_out * W_out * Cout) * 4))

    out_pad = pl.pallas_call(
        kernel,
        out_shape=jax.ShapeDtypeStruct((N, H_out, W_out, cout_pad), jnp.float32),
        grid_spec=pltpu.PrefetchScalarGridSpec(
            num_scalar_prefetch=0,
            grid=grid,
            in_specs=[
                # temp scalar lives in SMEM.
                pl.BlockSpec(block_shape=(1,), index_map=lambda n, r: (0,),
                             memory_space=pltpu.MemorySpace.SMEM),
                # Padded activations: one batch element per grid step, constant
                # index on the row axis => resident across its row tiles.
                pl.BlockSpec((1, Hp, Wp, Cin), lambda n, r: (n, 0, 0, 0)),
                # Reshaped weight / mask weight: tiny whole arrays, resident.
                pl.BlockSpec((kkc, cout_pad), lambda n, r: (0, 0)),
                pl.BlockSpec((kkc, cout_pad), lambda n, r: (0, 0)),
            ],
            out_specs=pl.BlockSpec((1, block_h, W_out, cout_pad),
                                   lambda n, r: (n, r, 0, 0)),
            scratch_shapes=[pltpu.VMEM((kkc, cout_pad), jnp.bfloat16)],
        ),
        compiler_params=pltpu.CompilerParams(
            dimension_semantics=("parallel", "arbitrary"),
            vmem_limit_bytes=vmem_limit),
        cost_estimate=cost,
    )(temp_arr, x_pad, w_mat, mw_mat)

    # Drop channel padding, back to torch's NCHW output convention.
    return jnp.transpose(out_pad[..., :Cout], (0, 3, 1, 2))


def _reference(x_nchw, weight_oihw, mask_weight_oihw, *, temp, ticket, stride,
               padding, mask_initial_value):
    """Pure-JAX (f32) reference mirroring the PyTorch forward."""
    scaling = 1.0 + math.exp(-mask_initial_value)
    if ticket:
        mask = (mask_weight_oihw > 0).astype(jnp.float32)
    else:
        mask = jax.nn.sigmoid(temp * mask_weight_oihw)
    mw = weight_oihw * (scaling * mask)
    return jax.lax.conv_general_dilated(
        x_nchw, mw, window_strides=(stride, stride),
        padding=[(padding, padding), (padding, padding)],
        dimension_numbers=('NCHW', 'OIHW', 'NCHW'))


if __name__ == "__main__":
    # Module-consistent small shapes: batch=2, in_channels=4, out_channels=8,
    # spatial 16x16, kernel_size=3, padding=1, stride=1.
    N, Cin, Cout, H, W, K = 2, 4, 8, 16, 16, 3
    padding, stride = 1, 1
    mask_initial_value = 0.3          # constant init of mask_weight (init_mask)
    temp = 2.5

    key = jax.random.PRNGKey(0)
    kx, kw = jax.random.split(key)
    x = jax.random.normal(kx, (N, Cin, H, W), jnp.float32)
    fan_in = Cin * K * K              # kaiming_normal_ (fan_in, gain sqrt(2))
    weight = jax.random.normal(kw, (Cout, Cin, K, K), jnp.float32) * math.sqrt(2.0 / fan_in)
    mask_weight = jnp.full((Cout, Cin, K, K), mask_initial_value, jnp.float32)

    # Soft-mask path (ticket=False). block_h=8 -> grid (2, 2) exercises row tiling.
    out = soft_masked_conv2d(x, weight, mask_weight, temp=temp, ticket=False,
                             stride=stride, padding=padding,
                             mask_initial_value=mask_initial_value, block_h=8)
    out = jax.block_until_ready(out)
    ref = _reference(x, weight, mask_weight, temp=temp, ticket=False, stride=stride,
                     padding=padding, mask_initial_value=mask_initial_value)
    assert out.shape == (N, Cout, H, W), out.shape
    # bf16 matmul operands with f32 accumulation -> loosened tolerance.
    assert jnp.allclose(out, ref, rtol=5e-2, atol=5e-2), float(jnp.max(jnp.abs(out - ref)))

    # Hard-threshold path (ticket=True).
    out_t = soft_masked_conv2d(x, weight, mask_weight, temp=temp, ticket=True,
                               stride=stride, padding=padding,
                               mask_initial_value=mask_initial_value, block_h=8)
    out_t = jax.block_until_ready(out_t)
    ref_t = _reference(x, weight, mask_weight, temp=temp, ticket=True, stride=stride,
                       padding=padding, mask_initial_value=mask_initial_value)
    assert jnp.allclose(out_t, ref_t, rtol=5e-2, atol=5e-2), \
        float(jnp.max(jnp.abs(out_t - ref_t)))

    print("KERNEL_OK")
</pallas_src>

<mosaic_0001>
module attributes {stable_mosaic.version = 11 : i64} {
  func.func @_soft_masked_conv_kernel(%arg0: i32, %arg1: i32, %arg2: memref<1xf32, #tpu.memory_space<smem>>, %arg3: memref<1x18x18x4xf32, #tpu.memory_space<vmem>>, %arg4: memref<36x128xf32, #tpu.memory_space<vmem>>, %arg5: memref<36x128xf32, #tpu.memory_space<vmem>>, %arg6: memref<1x8x16x128xf32, #tpu.memory_space<vmem>>, %arg7: memref<36x128xbf16, #tpu.memory_space<vmem>>) attributes {dimension_semantics = [#tpu.dimension_semantics<parallel>, #tpu.dimension_semantics<arbitrary>], iteration_bounds = array<i64: 2, 2>, scalar_prefetch = 0 : i64, scratch_operands = 1 : i64, tpu.core_type = #tpu.core_type<tc>, window_params = [{transform_indices = @transform_0, window_bounds = array<i64: 1>}, {transform_indices = @transform_1, window_bounds = array<i64: 1, 18, 18, 4>}, {pipeline_mode = #tpu.pipeline_mode<synchronous>, transform_indices = @transform_2, window_bounds = array<i64: 36, 128>}, {pipeline_mode = #tpu.pipeline_mode<synchronous>, transform_indices = @transform_3, window_bounds = array<i64: 36, 128>}, {transform_indices = @transform_4, window_bounds = array<i64: 1, 8, 16, 128>}]} {
    %c0_i32 = arith.constant 0 : i32
    %0 = arith.cmpi eq, %arg1, %c0_i32 : i32
    %1 = arith.extui %0 : i1 to i32
    %c0_i32_0 = arith.constant 0 : i32
    %2 = arith.cmpi ne, %1, %c0_i32_0 : i32
    scf.if %2 {
      %c0_9 = arith.constant 0 : index
      %c0_10 = arith.constant 0 : index
      %23 = vector.load %arg4[%c0_9, %c0_10] : memref<36x128xf32, #tpu.memory_space<vmem>>, vector<36x128xf32>
      %c0_11 = arith.constant 0 : index
      %c0_12 = arith.constant 0 : index
      %24 = vector.load %arg5[%c0_11, %c0_12] : memref<36x128xf32, #tpu.memory_space<vmem>>, vector<36x128xf32>
      %c0_13 = arith.constant 0 : index
      %25 = memref.load %arg2[%c0_13] : memref<1xf32, #tpu.memory_space<smem>>
      %26 = vector.broadcast %25 : f32 to vector<36x128xf32>
      %27 = arith.mulf %26, %24 : vector<36x128xf32>
      %28 = arith.negf %27 : vector<36x128xf32>
      %29 = math.exp %28 : vector<36x128xf32>
      %cst_14 = arith.constant 1.000000e+00 : f32
      %30 = vector.broadcast %cst_14 : f32 to vector<36x128xf32>
      %31 = arith.addf %30, %29 : vector<36x128xf32>
      %32 = arith.divf %30, %31 : vector<36x128xf32>
      %cst_15 = arith.constant 1.74081826 : f32
      %33 = vector.broadcast %cst_15 : f32 to vector<36x128xf32>
      %34 = arith.mulf %33, %32 : vector<36x128xf32>
      %35 = arith.mulf %23, %34 : vector<36x128xf32>
      %36 = arith.truncf %35 : vector<36x128xf32> to vector<36x128xbf16>
      %c0_16 = arith.constant 0 : index
      %c0_17 = arith.constant 0 : index
      %37 = vector.load %arg7[%c0_16, %c0_17] : memref<36x128xbf16, #tpu.memory_space<vmem>>, vector<36x128xbf16>
      tpu.vector_store %arg7[%c0_16, %c0_17], %36 {strides = array<i32>} : memref<36x128xbf16, #tpu.memory_space<vmem>>, vector<36x128xbf16>,
    } else {
    }
    %c8_i32 = arith.constant 8 : i32
    %3 = arith.muli %arg1, %c8_i32 : i32
    %4 = tpu.assume_multiple %3, 8 : i32
    %c0 = arith.constant 0 : index
    %5 = arith.index_cast %4 : i32 to index
    %c0_1 = arith.constant 0 : index
    %c0_2 = arith.constant 0 : index
    %6 = vector.load %arg3[%c0, %5, %c0_1, %c0_2] : memref<1x18x18x4xf32, #tpu.memory_space<vmem>>, vector<1x10x18x4xf32>
    %7 = arith.truncf %6 : vector<1x10x18x4xf32> to vector<1x10x18x4xbf16>
    %8 = vector.extract_strided_slice %7 {offsets = [0, 0, 0, 0], sizes = [1, 8, 16, 4], strides = [1, 1, 1, 1]} : vector<1x10x18x4xbf16> to vector<1x8x16x4xbf16>
    %9 = vector.extract_strided_slice %7 {offsets = [0, 0, 1, 0], sizes = [1, 8, 16, 4], strides = [1, 1, 1, 1]} : vector<1x10x18x4xbf16> to vector<1x8x16x4xbf16>
    %10 = vector.extract_strided_slice %7 {offsets = [0, 0, 2, 0], sizes = [1, 8, 16, 4], strides = [1, 1, 1, 1]} : vector<1x10x18x4xbf16> to vector<1x8x16x4xbf16>
    %11 = vector.extract_strided_slice %7 {offsets = [0, 1, 0, 0], sizes = [1, 8, 16, 4], strides = [1, 1, 1, 1]} : vector<1x10x18x4xbf16> to vector<1x8x16x4xbf16>
    %12 = vector.extract_strided_slice %7 {offsets = [0, 1, 1, 0], sizes = [1, 8, 16, 4], strides = [1, 1, 1, 1]} : vector<1x10x18x4xbf16> to vector<1x8x16x4xbf16>
    %13 = vector.extract_strided_slice %7 {offsets = [0, 1, 2, 0], sizes = [1, 8, 16, 4], strides = [1, 1, 1, 1]} : vector<1x10x18x4xbf16> to vector<1x8x16x4xbf16>
    %14 = vector.extract_strided_slice %7 {offsets = [0, 2, 0, 0], sizes = [1, 8, 16, 4], strides = [1, 1, 1, 1]} : vector<1x10x18x4xbf16> to vector<1x8x16x4xbf16>
    %15 = vector.extract_strided_slice %7 {offsets = [0, 2, 1, 0], sizes = [1, 8, 16, 4], strides = [1, 1, 1, 1]} : vector<1x10x18x4xbf16> to vector<1x8x16x4xbf16>
    %16 = vector.extract_strided_slice %7 {offsets = [0, 2, 2, 0], sizes = [1, 8, 16, 4], strides = [1, 1, 1, 1]} : vector<1x10x18x4xbf16> to vector<1x8x16x4xbf16>
    %17 = tpu.concatenate %8, %9, %10, %11, %12, %13, %14, %15, %16 in 3 : vector<1x8x16x4xbf16>, vector<1x8x16x4xbf16>, vector<1x8x16x4xbf16>, vector<1x8x16x4xbf16>, vector<1x8x16x4xbf16>, vector<1x8x16x4xbf16>, vector<1x8x16x4xbf16>, vector<1x8x16x4xbf16>, vector<1x8x16x4xbf16> -> vector<1x8x16x36xbf16>
    %18 = vector.shape_cast %17 : vector<1x8x16x36xbf16> to vector<128x36xbf16>
    %c0_3 = arith.constant 0 : index
    %c0_4 = arith.constant 0 : index
    %19 = vector.load %arg7[%c0_3, %c0_4] : memref<36x128xbf16, #tpu.memory_space<vmem>>, vector<36x128xbf16>
    %cst = arith.constant dense<0.000000e+00> : vector<128x128xf32>
    %20 = tpu.matmul %18, %19, %cst {dimension_numbers = #tpu.dot_dimension_numbers<[1], [0], [0], [1], [0, 0, 1, 1], [], []>} : vector<128x36xbf16>, vector<36x128xbf16>, vector<128x128xf32> -> vector<128x128xf32>
    %21 = vector.shape_cast %20 : vector<128x128xf32> to vector<1x8x16x128xf32>
    %c0_5 = arith.constant 0 : index
    %c0_6 = arith.constant 0 : index
    %c0_7 = arith.constant 0 : index
    %c0_8 = arith.constant 0 : index
    %22 = vector.load %arg6[%c0_5, %c0_6, %c0_7, %c0_8] : memref<1x8x16x128xf32, #tpu.memory_space<vmem>>, vector<1x8x16x128xf32>
    tpu.vector_store %arg6[%c0_5, %c0_6, %c0_7, %c0_8], %21 {strides = array<i32>} : memref<1x8x16x128xf32, #tpu.memory_space<vmem>>, vector<1x8x16x128xf32>,
    return
  }
  func.func @transform_0(%arg0: i32, %arg1: i32) -> i32 {
    %c0_i32 = arith.constant 0 : i32
    %c0_i32_0 = arith.constant 0 : i32
    return %c0_i32 : i32
  }
  func.func @transform_1(%arg0: i32, %arg1: i32) -> (i32, i32, i32, i32) {
    %c0_i32 = arith.constant 0 : i32
    %c0_i32_0 = arith.constant 0 : i32
    %c0_i32_1 = arith.constant 0 : i32
    %c0_i32_2 = arith.constant 0 : i32
    return %arg0, %c0_i32, %c0_i32_0, %c0_i32_1 : i32, i32, i32, i32
  }
  func.func @transform_2(%arg0: i32, %arg1: i32) -> (i32, i32) {
    %c0_i32 = arith.constant 0 : i32
    %c0_i32_0 = arith.constant 0 : i32
    %c0_i32_1 = arith.constant 0 : i32
    return %c0_i32, %c0_i32_0 : i32, i32
  }
  func.func @transform_3(%arg0: i32, %arg1: i32) -> (i32, i32) {
    %c0_i32 = arith.constant 0 : i32
    %c0_i32_0 = arith.constant 0 : i32
    %c0_i32_1 = arith.constant 0 : i32
    return %c0_i32, %c0_i32_0 : i32, i32
  }
  func.func @transform_4(%arg0: i32, %arg1: i32) -> (i32, i32, i32, i32) {
    %c0_i32 = arith.constant 0 : i32
    %c0_i32_0 = arith.constant 0 : i32
    %c0_i32_1 = arith.constant 0 : i32
    return %arg0, %arg1, %c0_i32, %c0_i32_0 : i32, i32, i32, i32
  }
}

</mosaic_0001>

<bundles_post_ra>
// kernel: tpu_custom_call.1
= control target key start
LH: loop header
LB: loop body
LE: loop exit
PB: predicated region body
PF: predicated region fallthrough
CT: control target
= control target key end

     0   :  { %s1904_s0 = inlined_call_operand.<no memory space> [shape: f32[1], index: 0, kind: input, shape index: {}]   ;;  %s1905_s1 = inlined_call_operand.vmem [shape: f32[2,18,18,4], index: 1, kind: input, shape index: {}]   ;;  %s1906_s2 = inlined_call_operand.vmem [shape: f32[36,128], index: 2, kind: input, shape index: {}]   ;;  %s1907_s3 = inlined_call_operand.vmem [shape: f32[36,128], index: 3, kind: input, shape index: {}]   ;;  %s1908_s4 = inlined_call_operand.hbm [shape: f32[2,16,16,128], index: 4, kind: output, shape index: {}]  }
   0x1   :  { %9 = sst [smem:[#allocation3]] %s1904_s0 }
   0x2   :  { %10 = vsyncpa [#allocation5], 0 }
   0x3   :  { %12 = vsyncpa [#allocation5 + $0x1], 0  ;;  %s1372_s17 = smov 0   ;;  %s1374_s18 = smov 0  }
   0x4   :  { %s1376_s19 = smov 0   ;;  %s1378_s20 = smov 0  }
   0x5   :  { %s1380_s21 = smov 0   ;;  %s1382_s22 = smov 0  }
   0x6   :  { %s1384_s23 = smov 0   ;;  %s1386_s24 = smov 0  }
   0x7 LB: > { %s1038_s0 = sadd.s32 4294967295, %s1332_s24   ;;  %s1039_s25 = sadd.s32 4294967294, %s1332_s24   ;;  %s1332_s24 = sphi %s1386_s24, %s18_s24   ;;  %s1328_s23 = sphi %s1384_s23, %s1917_s23   ;;  %s1324_s22 = sphi %s1382_s22, %s1916_s22   ;;  %s1320_s21 = sphi %s1380_s21, %s1915_s21   ;;  %s1316_s20 = sphi %s1378_s20, %s1914_s20   ;;  %s1312_s19 = sphi %s1376_s19, %s1913_s19   ;;  %s1308_s18 = sphi %s1374_s18, %s1912_s18   ;;  %s1304_s17 = sphi %s1372_s17, %s1911_s17  }
   0x8   : > { %s27_s26 = sadd.s32 1, %s1324_s22  ;;  %s30_s27 = sadd.s32 1, %s1328_s23 }
   0x9   : > { %p28_p0 = scmp.ge.s32.totalorder %s27_s26, 2  ;;  %p138_p1 = scmp.ne.s32.totalorder %s1312_s19, %s1308_s18 }
   0xa   : > { %p139_p2 = scmp.eq.s32.totalorder %s1038_s0, 3  ;;  %p144_p5 = scmp.ne.s32.totalorder %s1308_s18, %s1304_s17 }
   0xb   : > { %s1919_s26 = smov (%p28_p0, %s27_s26), 0  ;;  %s1921_s27 = smov (!%p28_p0, %s30_s27), %s1328_s23 }
   0xc   : > { %s124_s28 = ssub.s32 %s1324_s22, %s1919_s26  ;;  %p1423_p3 = por %p139_p2, %p138_p1 }
   0xd   : > { %p32_p4 = scmp.ge.s32.totalorder %s1921_s27, 2  ;;  %p145_p6 = scmp.eq.s32.totalorder %s1039_s25, 3 }
   0xe   : > { %p1042_p7 = scmp.ge.s32.totalorder %s1332_s24, 1  ;;  %p180_p9 = scmp.lt.s32.totalorder %s1332_s24, 5 }
   0xf   : > { %s1923_s27 = smov (%p32_p4, %s1921_s27), 0  ;;  %p1432_p8 = por %p145_p6, %p144_p5 }
  0x10   : > { %s123_s5 = ssub.s32 %s1328_s23, %s1923_s27  ;;  %s128_s6 = sadd.s32 1, %s1312_s19 }
  0x11   : > { %s125_s7 = sor.u32 %s124_s28, %s123_s5  ;;  %p181_p10 = pnand %p1042_p7, %p180_p9 }
  0x12   : > { %p126_p11 = scmp.eq.s32.totalorder %s125_s7, 0  ;;  %s203_s9 = sand.u32 (!%p181_p10), 1, %s1308_s18  }
  0x13   : > { %184 = sbr.rel (%p181_p10) target bundleno = 553 (0x229), region = 36  ;;  %p206_p12 = scmp.lt.s32.totalorder (!%p181_p10), %s1320_s21, 1 }
  0x14   : > { %s1441_s8 = scalar_select %p126_p11, %s1312_s19, %s128_s6  }
  0x15   : > { %s1043_s10 = sshll.u32 (!%p181_p10), %s203_s9, 7  ;;  %p1045_p13 = scmp.ne.s32.totalorder (!%p181_p10), %s1316_s20, 0 }
  0x16   : > { %s1453_s16 = scalar_lea.vmem (!%p181_p10), [#allocation4], %s1043_s10 }
  0x1a   : > { %s207_s11 = scalar_select %p206_p12, %s1320_s21, 1 }
  0x1b   : > { %216 = sbr.rel (%p1045_p13) target bundleno = 73 (0x49), region = 40  ;;  %s227_s0 = sld [smem:[#allocation3]] (!%p1045_p13)  ;;  %v222_v0 = vld [vmem:[%s1907_s3] sm:$0xff] (!%p1045_p13)  ;;  %v223_v1 = vld [vmem:[%s1907_s3 + $0x8] sm:$0xff] (!%p1045_p13)  ;;  %v224_v2 = vld [vmem:[%s1907_s3 + $0x10] sm:$0xff] (!%p1045_p13) }
  0x1c   : > { %s1134_s12 = smul.u32 432, %s207_s11  ;;  %v225_v3 = vld [vmem:[%s1907_s3 + $0x18] sm:$0xff] (!%p1045_p13)  ;;  %v226_v4 = vld [vmem:[%s1907_s3 + $0x20] sm:$0xf] (!%p1045_p13)  ;;  %v218_v29 = vld [vmem:[%s1906_s2 + $0x8] sm:$0xff] (!%p1045_p13) }
  0x1d   : > { %v217_v27 = vld [vmem:[%s1906_s2] sm:$0xff] (!%p1045_p13)  ;;  %v219_v33 = vld [vmem:[%s1906_s2 + $0x10] sm:$0xff] (!%p1045_p13)  ;;  %v220_v36 = vld [vmem:[%s1906_s2 + $0x18] sm:$0xff] (!%p1045_p13) }
  0x1e   : > { %s1451_s15 = scalar_lea.vmem %s1905_s1, %s1134_s12  ;;  %v221_v41 = vld [vmem:[%s1906_s2 + $0x20] sm:$0xf] (!%p1045_p13) }
  0x21   : > { %v228_v5 = vstv (!%p1045_p13), %s227_s0 }
  0x22   : > { %v229_v6 = vmul.f32 %v228_v5, %v222_v0  ;;  %v230_v7 = vmul.f32 %v228_v5, %v223_v1  ;;  %v231_v8 = vmul.f32 %v228_v5, %v224_v2  ;;  %v232_v9 = vmul.f32 %v228_v5, %v225_v3 }
  0x23   : > { %v233_v10 = vmul.f32 %v228_v5, %v226_v4 }
  0x24   : > { %v1046_v11 = vmul.f32 -1.442695, %v229_v6  ;;  %v1047_v12 = vmul.f32 -1.442695, %v230_v7  ;;  %v1048_v13 = vmul.f32 -1.442695, %v231_v8 }
  0x25   : > { %v1049_v14 = vmul.f32 -1.442695, %v232_v9  ;;  %v1050_v15 = vmul.f32 -1.442695, %v233_v10 }
  0x26   : > { %1215 = vpow2.f32 %v1046_v11 }
  0x27   : > { %1217 = vpow2.f32 %v1047_v12 }
  0x28   : > { %1219 = vpow2.f32 %v1048_v13 }
  0x29   : > { %1221 = vpow2.f32 %v1049_v14 }
  0x2a   : > { %1223 = vpow2.f32 %v1050_v15 }
  0x30   : > { %v1216_v16 = vpop.eup %1215 }
  0x31   : > { %v1218_v17 = vpop.eup %1217  ;;  %v249_v18 = vadd.f32 1.0, %v1216_v16 }
  0x32   : > { %v1220_v19 = vpop.eup %1219  ;;  %v250_v20 = vadd.f32 1.0, %v1218_v17 }
  0x33   : > { %v1222_v21 = vpop.eup %1221  ;;  %1225 = vrcp.f32 %v249_v18  ;;  %v251_v22 = vadd.f32 1.0, %v1220_v19 }
  0x34   : > { %v1224_v23 = vpop.eup %1223  ;;  %1227 = vrcp.f32 %v250_v20  ;;  %v252_v24 = vadd.f32 1.0, %v1222_v21 }
  0x35   : > { %1229 = vrcp.f32 %v251_v22  ;;  %v253_v25 = vadd.f32 1.0, %v1224_v23 }
  0x36   : > { %1231 = vrcp.f32 %v252_v24 }
  0x37   : > { %1233 = vrcp.f32 %v253_v25 }
  0x3d   : > { %v1226_v26 = vpop.eup %1225 }
  0x3e   : > { %v1228_v28 = vpop.eup %1227  ;;  %v264_v30 = vmul.f32 1.7408183, %v1226_v26 }
  0x3f   : > { %v1230_v31 = vpop.eup %1229  ;;  %v265_v32 = vmul.f32 1.7408183, %v1228_v28 }
  0x40   : > { %v1232_v34 = vpop.eup %1231  ;;  %v269_v35 = vmul.f32 %v264_v30, %v217_v27  ;;  %v266_v37 = vmul.f32 1.7408183, %v1230_v31 }
  0x41   : > { %v1234_v38 = vpop.eup %1233  ;;  %v270_v39 = vmul.f32 %v265_v32, %v218_v29  ;;  %v267_v40 = vmul.f32 1.7408183, %v1232_v34 }
  0x42   : > { %v271_v42 = vmul.f32 %v266_v37, %v219_v33  ;;  %v268_v43 = vmul.f32 1.7408183, %v1234_v38 }
  0x43   : > { %v1085_v44 = vpack.c.bf16 %v270_v39, %v269_v35  ;;  %v272_v45 = vmul.f32 %v267_v40, %v220_v36 }
  0x44   : > { %v273_v46 = vmul.f32 %v268_v43, %v221_v41 }
  0x45   : > { %1086 = vst [vmem:[#allocation2] sm:$0xff] %v1085_v44   ;;  %v1090_v47 = vpack.c.bf16 %v272_v45, %v271_v42 }
  0x46   : > { %v1080_v48 = vpack.c.bf16 %v273_v46, %v273_v46 }
  0x47   : > { %1092 = vst [vmem:[#allocation2 + $0x8] sm:$0xff] %v1090_v47  }
  0x48   : > { %299 = vst [vmem:[#allocation2 + $0x10] sm:$0x3] %v1080_v48 }
  0x49 PF: > { %s1057_s14 = smul.u32 192, %s1316_s20  ;;  %vm482_vm0 = vcmask 1046528   ;;  %vm353_vm1 = vsmask.f32 7424  ;;  %s1335_s25 = smov 4   ;;  %vm826_vm2 = vcmask 1041408  }
  0x4a   : > { %s1336_s28 = smov 12   ;;  %s1337_s5 = smov 16   ;;  %vm653_vm3 = vcmask 31744   ;;  %vm670_vm4 = vcmask 64512   ;;  %vm687_vm5 = vcmask 97280   ;;  %vm704_vm6 = vcmask 130048  }
  0x4b   : > { %s1488_s0 = scalar_lea.vmem %s1451_s15, %s1057_s14  ;;  %s1334_s15 = smov 8   ;;  %vm721_vm7 = vcmask 162816   ;;  %vm738_vm8 = vcmask 195584   ;;  %vm755_vm9 = vcmask 228352   ;;  %vm772_vm10 = vcmask 261120  }
  0x4c   : > { %v315_v49 = vld [vmem:[%s1488_s0 + $0x60] sm:$0xff]  ;;  %v316_v50 = vld [vmem:[%s1488_s0 + $0x68] sm:$0xff]  ;;  %v317_v51 = vld [vmem:[%s1488_s0 + $0x70] sm:$0x3]  ;;  %s1338_s6 = smov 20   ;;  %s1339_s7 = smov 24  }
  0x4d   : > { %v1493_v52 = vpack.c.bf16 %v316_v50, %v315_v49  ;;  %v1495_v53 = vpack.c.bf16 %v317_v51, %v317_v51  ;;  %v303_v54 = vld [vmem:[%s1488_s0] sm:$0xff]  ;;  %v304_v55 = vld [vmem:[%s1488_s0 + $0x8] sm:$0xff]  ;;  %v305_v56 = vld [vmem:[%s1488_s0 + $0x10] sm:$0x3]  ;;  %s1340_s11 = smov 28   ;;  %s1341_s12 = smov 32  }
  0x4e   : > { %v1500_v57 = vpack.c.bf16 %v304_v55, %v303_v54  ;;  %v334_v58 = vpack.c.bf16 %v305_v56, %v305_v56  ;;  %v318_v59 = vld [vmem:[%s1488_s0 + $0x78] sm:$0xff]  ;;  %v319_v60 = vld [vmem:[%s1488_s0 + $0x80] sm:$0xff]  ;;  %v320_v61 = vld [vmem:[%s1488_s0 + $0x88] sm:$0x3]  ;;  %vm809_vm11 = vcmask 293888   ;;  %s1081_s13 = sshll.u32 %s1316_s20, 4 }
  0x4f   : > { %v495_v62 = vrot.slane %v1493_v52, 1  ;;  %v496_v63 = vrot.slane %v1495_v53, 1  ;;  %v1507_v0 = vpack.c.bf16 %v319_v60, %v318_v59  ;;  %v344_v1 = vpack.c.bf16 %v320_v61, %v320_v61  ;;  %v306_v2 = vld [vmem:[%s1488_s0 + $0x18] sm:$0xff]  ;;  %v307_v3 = vld [vmem:[%s1488_s0 + $0x20] sm:$0xff]  ;;  %v308_v4 = vld [vmem:[%s1488_s0 + $0x28] sm:$0x3] }
  0x50   : > { %v483_v5 = vrot.slane %v1500_v57, 1  ;;  %v484_v6 = vrot.slane %v334_v58, 1  ;;  %v1513_v7 = vpack.c.bf16 %v307_v3, %v306_v2  ;;  %v336_v8 = vpack.c.bf16 %v308_v4, %v308_v4  ;;  %v321_v33 = vld [vmem:[%s1488_s0 + $0x90] sm:$0xff]  ;;  %v322_v38 = vld [vmem:[%s1488_s0 + $0x98] sm:$0xff]  ;;  %v323_v49 = vld [vmem:[%s1488_s0 + $0xa0] sm:$0x3] }
  0x51   : > { %v1516_v9 = vsel %vm482_vm0, %v495_v62, %v496_v63  ;;  %v498_v10 = vrot.slane %v1507_v0, 1  ;;  %v499_v11 = vrot.slane %v344_v1, 1  ;;  %v355_v12 = vshrl.u32 %v1500_v57, 16  ;;  %v309_v39 = vld [vmem:[%s1488_s0 + $0x30] sm:$0xff]  ;;  %v310_v40 = vld [vmem:[%s1488_s0 + $0x38] sm:$0xff]  ;;  %v327_v60 = vld [vmem:[%s1488_s0 + $0xc0] sm:$0xff] }
  0x52   : > { %515 = vrot.lane.b32.xlu1 %v1516_v9, %s1334_s15  ;;  %v485_v13 = vsel %vm482_vm0, %v483_v5, %v484_v6  ;;  %v486_v14 = vrot.slane %v1513_v7, 1  ;;  %v487_v15 = vrot.slane %v336_v8, 1  ;;  %v367_v16 = vshrl.u32 %v1513_v7, 16  ;;  %v311_v54 = vld [vmem:[%s1488_s0 + $0x40] sm:$0x3]  ;;  %v328_v61 = vld [vmem:[%s1488_s0 + $0xc8] sm:$0xff] }
  0x53   : > { %507 = vrot.lane.b32.xlu0 %v485_v13, %s1334_s15  ;;  %v1527_v17 = vsel %vm482_vm0, %v498_v10, %v499_v11  ;;  %v369_v18 = vshll.u32 %v1513_v7, 16  ;;  %v374_v19 = vshll.u32 %v336_v8, 16  ;;  %v357_v20 = vshll.u32 %v1500_v57, 16  ;;  %v329_v62 = vld [vmem:[%s1488_s0 + $0xd0] sm:$0x3]  ;;  %v330_v4 = vld [vmem:[%s1488_s0 + $0xd8] sm:$0xff] }
  0x54   : > { %v1532_v21 = vsel %vm482_vm0, %v486_v14, %v487_v15  ;;  %v362_v22 = vshll.u32 %v334_v58, 16  ;;  %v415_v23 = vshrl.u32 %v1507_v0, 16  ;;  %v417_v24 = vshll.u32 %v1507_v0, 16  ;;  %v331_v5 = vld [vmem:[%s1488_s0 + $0xe0] sm:$0xff]  ;;  %v332_v10 = vld [vmem:[%s1488_s0 + $0xe8] sm:$0x3] }
  0x55   : > { %v371_v25 = vrot.slane %v369_v18, 1  ;;  %v376_v26 = vrot.slane %v374_v19, 1  ;;  %v359_v27 = vrot.slane %v357_v20, 1  ;;  %v422_v28 = vshll.u32 %v344_v1, 16  ;;  %s1072_s10 = sshll.u32 %s1320_s21, 5 }
  0x56   : > { %517 = vrot.lane.b32.xlu1 %v1527_v17, %s1334_s15  ;;  %v364_v29 = vrot.slane %v362_v22, 1  ;;  %v419_v30 = vrot.slane %v417_v24, 1  ;;  %v403_v31 = vshrl.u32 %v1493_v52, 16  ;;  %v405_v32 = vshll.u32 %v1493_v52, 16  ;;  %s957_s14 = sadd.s32 %s1081_s13, %s1072_s10 }
  0x57   : > { %509 = vrot.lane.b32.xlu0 %v1532_v21, %s1334_s15  ;;  %v372_v34 = vor.u32 %v371_v25, %v367_v16  ;;  %v360_v35 = vor.u32 %v359_v27, %v355_v12  ;;  %v424_v36 = vrot.slane %v422_v28, 1  ;;  %v410_v37 = vshll.u32 %v1495_v53, 16 }
  0x58   : > { %v420_v41 = vor.u32 %v419_v30, %v415_v23  ;;  %v407_v42 = vrot.slane %v405_v32, 1  ;;  %v1550_v47 = vpack.c.bf16 %v322_v38, %v321_v33  ;;  %v1552_v48 = vpack.c.bf16 %v310_v40, %v309_v39 }
  0x59   : > { %v377_v43 = vsel %vm353_vm1, %v372_v34, %v376_v26  ;;  %v365_v44 = vsel %vm353_vm1, %v360_v35, %v364_v29  ;;  %v412_v45 = vrot.slane %v410_v37, 1  ;;  %v1562_v53 = vpack.c.bf16 %v323_v49, %v323_v49  ;;  %v325_v49 = vld [vmem:[%s1488_s0 + $0xb0] sm:$0xff] }
  0x5a   : > { %452 = vrot.lane.b32.xlu1 %v377_v43, %s1335_s25  ;;  %v408_v46 = vor.u32 %v407_v42, %v403_v31  ;;  %v1557_v50 = vsel %vm353_vm1, %v420_v41, %v424_v36  ;;  %v429_v55 = vshll.u32 %v1550_v47, 16  ;;  %v381_v56 = vshll.u32 %v1552_v48, 16 }
  0x5b   : > { %450 = vrot.lane.b32.xlu0 %v365_v44, %s1335_s25  ;;  %v1571_v58 = vpack.c.bf16 %v311_v54, %v311_v54  ;;  %v434_v59 = vshll.u32 %v1562_v53, 16  ;;  %v427_v63 = vshrl.u32 %v1550_v47, 16  ;;  %v379_v2 = vshrl.u32 %v1552_v48, 16  ;;  %v312_v54 = vld [vmem:[%s1488_s0 + $0x48] sm:$0xff] }
  0x5c   : > { %v1560_v51 = vsel %vm353_vm1, %v408_v46, %v412_v45  ;;  %v431_v1 = vrot.slane %v429_v55, 1  ;;  %v383_v3 = vrot.slane %v381_v56, 1  ;;  %v1586_v8 = vpack.c.bf16 %v328_v61, %v327_v60  ;;  %v324_v46 = vld [vmem:[%s1488_s0 + $0xa8] sm:$0xff]  ;;  %v313_v55 = vld [vmem:[%s1488_s0 + $0x50] sm:$0xff]  ;;  %v326_v60 = vld [vmem:[%s1488_s0 + $0xb8] sm:$0x3] }
  0x5d   : > { %v386_v6 = vshll.u32 %v1571_v58, 16  ;;  %v436_v11 = vrot.slane %v434_v59, 1  ;;  %v350_v12 = vpack.c.bf16 %v329_v62, %v329_v62  ;;  %v1589_v13 = vpack.c.bf16 %v331_v5, %v330_v4  ;;  %v314_v61 = vld [vmem:[%s1488_s0 + $0x58] sm:$0x3]  ;;  %s1073_s0 = sshll.u32 %s957_s14, 7 }
  0x5e   : > { %460 = vrot.lane.b32.xlu1 %v1557_v50, %s1335_s25  ;;  %v432_v14 = vor.u32 %v431_v1, %v427_v63  ;;  %v384_v15 = vor.u32 %v383_v3, %v379_v2  ;;  %v541_v16 = vshrl.u32 %v1586_v8, 16  ;;  %v543_v18 = vshll.u32 %v1586_v8, 16  ;;  %v1235_v2 = vld [vmem:[#allocation2] sm:$0xff]   ;;  %s1840_s21 = scalar_lea.hbm %s1908_s4, %s1073_s0 }
  0x5f   : > { %458 = vrot.lane.b32.xlu0 %v1560_v51, %s1335_s25  ;;  %v548_v19 = vshll.u32 %v350_v12, 16  ;;  %v569_v20 = vrot.slane %v1586_v8, 1  ;;  %v570_v22 = vrot.slane %v350_v12, 1  ;;  %v352_v23 = vpack.c.bf16 %v332_v10, %v332_v10  ;;  %1104 = vmatprep.subr.bf16.mxu0 %v1235_v2  ;;  %v1236_v12 = vld [vmem:[#allocation2 + $0x8] sm:$0xff]  }
  0x60   : > { %v388_v24 = vrot.slane %v386_v6, 1  ;;  %v545_v25 = vrot.slane %v543_v18, 1  ;;  %v606_v26 = vshrl.u32 %v1589_v13, 16  ;;  %v608_v27 = vshll.u32 %v1589_v13, 16  ;;  %1126 = vmatprep.subr.bf16.mxu1 %v1235_v2  ;;  %1105 = vmatpush3.bf16.msra.mxu0 %v1235_v2 }
  0x61   : > { %v550_v28 = vrot.slane %v548_v19, 1  ;;  %v1601_v29 = vsel %vm482_vm0, %v569_v20, %v570_v22  ;;  %v613_v30 = vshll.u32 %v352_v23, 16  ;;  %v634_v31 = vrot.slane %v1589_v13, 1  ;;  %1129 = vmatpush3.bf16.msra.mxu1 %v1235_v2  ;;  %1106 = vmatprep.subr.bf16.mxu0 %v1236_v12  ;;  %v1237_v19 = vld [vmem:[#allocation2 + $0x10] ss:$0 sps:$4 sm:$0x33]  }
  0x62   : > { %532 = vrot.lane.b32.xlu1 %v1507_v0, %s1336_s28  ;;  %v546_v32 = vor.u32 %v545_v25, %v541_v16  ;;  %v610_v33 = vrot.slane %v608_v27, 1  ;;  %v635_v34 = vrot.slane %v352_v23, 1  ;;  %v1608_v35 = vsel %vm353_vm1, %v432_v14, %v436_v11  ;;  %1127 = vmatprep.subr.bf16.mxu1 %v1236_v12 }
  0x63   : > { %524 = vrot.lane.b32.xlu0 %v1513_v7, %s1336_s28  ;;  %v615_v36 = vrot.slane %v613_v30, 1  ;;  %v1611_v37 = vsel %vm353_vm1, %v384_v15, %v388_v24  ;;  %v501_v42 = vrot.slane %v1550_v47, 1  ;;  %v489_v44 = vrot.slane %v1552_v48, 1 }
  0x64   : > { %v1614_v38 = vsel %vm353_vm1, %v546_v32, %v550_v28  ;;  %v611_v39 = vor.u32 %v610_v33, %v606_v26  ;;  %v1617_v40 = vsel %vm482_vm0, %v634_v31, %v635_v34  ;;  %v490_v45 = vrot.slane %v1571_v58, 1  ;;  %1107 = vmatpush3.bf16.msra.mxu0 %v1236_v12 }
  0x65   : > { %v1641_v59 = vpack.c.bf16 %v325_v49, %v324_v46  ;;  %v1646_v58 = vpack.c.bf16 %v313_v55, %v312_v54  ;;  %v348_v62 = vpack.c.bf16 %v326_v60, %v326_v60  ;;  %v340_v63 = vpack.c.bf16 %v314_v61, %v314_v61  ;;  %1130 = vmatpush3.bf16.msra.mxu1 %v1236_v12 }
  0x66   : > { %534 = vrot.lane.b32.xlu1 %v1550_v47, %s1336_s28  ;;  %v1622_v41 = vsel %vm353_vm1, %v611_v39, %v615_v36  ;;  %1132 = vmatprep.subr.msk.bf16.mxu0 %vm826_vm2, %v1237_v19  ;;  %v828_v22 = vsel %vm826_vm2, %v1237_v19, 0 }
  0x67   : > { %526 = vrot.lane.b32.xlu0 %v1552_v48, %s1336_s28  ;;  %v393_v1 = vshll.u32 %v1646_v58, 16  ;;  %v439_v3 = vshrl.u32 %v1641_v59, 16  ;;  %v446_v5 = vshll.u32 %v348_v62, 16  ;;  %v391_v6 = vshrl.u32 %v1646_v58, 16  ;;  %1133 = vmatprep.subr.msk.bf16.mxu1 %vm826_vm2, %v1237_v19 }
  0x68   : > { %v398_v11 = vshll.u32 %v340_v63, 16  ;;  %1109 = vmatpush3.bf16.msra.mxu0 %v828_v22  ;;  %v504_v24 = vrot.slane %v1641_v59, 1  ;;  %v505_v25 = vrot.slane %v348_v62, 1  ;;  %v492_v26 = vrot.slane %v1646_v58, 1 }
  0x69   : > { %v395_v10 = vrot.slane %v393_v1, 1  ;;  %v448_v15 = vrot.slane %v446_v5, 1  ;;  %1131 = vmatpush3.bf16.msra.mxu1 %v828_v22  ;;  %v493_v27 = vrot.slane %v340_v63, 1 }
  0x6a   : > { %560 = vrot.lane.b32.xlu1 %v1557_v50, %s1337_s5  ;;  %v400_v18 = vrot.slane %v398_v11, 1  ;;  %v506_v28 = vsel %vm482_vm0, %v504_v24, %v505_v25 }
  0x6b   : > { %552 = vrot.lane.b32.xlu0 %v377_v43, %s1337_s5  ;;  %v502_v43 = vrot.slane %v1562_v53, 1  ;;  %v1644_v53 = vsel %vm482_vm0, %v489_v44, %v490_v45  ;;  %v396_v16 = vor.u32 %v395_v10, %v391_v6  ;;  %v494_v30 = vsel %vm482_vm0, %v492_v26, %v493_v27 }
  0x6d   : > { %v1639_v56 = vsel %vm482_vm0, %v501_v42, %v502_v43  ;;  %v401_v23 = vsel %vm353_vm1, %v396_v16, %v400_v18 }
  0x6e   : > { %562 = vrot.lane.b32.xlu1 %v1608_v35, %s1337_s5 }
  0x6f   : > { %554 = vrot.lane.b32.xlu0 %v1611_v37, %s1337_s5 }
  0x72   : > { %580 = vrot.lane.b32.xlu1 %v1527_v17, %s1338_s6 }
  0x73   : > { %572 = vrot.lane.b32.xlu0 %v1532_v21, %s1338_s6  ;;  %v441_v21 = vshll.u32 %v1641_v59, 16 }
  0x75   : > { %v443_v4 = vrot.slane %v441_v21, 1 }
  0x76   : > { %582 = vrot.lane.b32.xlu1 %v1639_v56, %s1338_s6 }
  0x77   : > { %574 = vrot.lane.b32.xlu0 %v1644_v53, %s1338_s6  ;;  %v444_v14 = vor.u32 %v443_v4, %v439_v3 }
  0x79   : > { %v449_v20 = vsel %vm353_vm1, %v444_v14, %v448_v15 }
  0x7a   : > { %597 = vrot.lane.b32.xlu1 %v1550_v47, %s1339_s7 }
  0x7b   : > { %589 = vrot.lane.b32.xlu0 %v1552_v48, %s1339_s7 }
  0x7e   : > { %599 = vrot.lane.b32.xlu1 %v1641_v59, %s1339_s7 }
  0x7f   : > { %591 = vrot.lane.b32.xlu0 %v1646_v58, %s1339_s7 }
  0x82   : > { %625 = vrot.lane.b32.xlu1 %v1608_v35, %s1340_s11 }
  0x83   : > { %617 = vrot.lane.b32.xlu0 %v1611_v37, %s1340_s11 }
  0x86   : > { %627 = vrot.lane.b32.xlu1 %v449_v20, %s1340_s11 }
  0x87   : > { %619 = vrot.lane.b32.xlu0 %v401_v23, %s1340_s11 }
  0x8a   : > { %645 = vrot.lane.b32.xlu1 %v1639_v56, %s1341_s12 }
  0x8b   : > { %637 = vrot.lane.b32.xlu0 %v1644_v53, %s1341_s12 }
  0x8e   : > { %462 = vrot.lane.b32.xlu1 %v1608_v35, %s1335_s25 }
  0x8f   : > { %454 = vrot.lane.b32.xlu0 %v1611_v37, %s1335_s25 }
  0x92   : > { %647 = vrot.lane.b32.xlu1 %v506_v28, %s1341_s12 }
  0x93   : > { %639 = vrot.lane.b32.xlu0 %v494_v30, %s1341_s12 }
  0x96   : > { %464 = vrot.lane.b32.xlu1 %v449_v20, %s1335_s25 }
  0x97   : > { %456 = vrot.lane.b32.xlu0 %v401_v23, %s1335_s25  ;;  %s960_s25 = sshll.u32 %s1453_s16, 4  ;;  %s1844_s25 = int_to_ptr.vmem [resolvable:$true] %s960_s25 }
  0x9a   : > { %519 = vrot.lane.b32.xlu1 %v1639_v56, %s1334_s15 }
  0x9b   : > { %511 = vrot.lane.b32.xlu0 %v1644_v53, %s1334_s15 }
  0x9e   : > { %521 = vrot.lane.b32.xlu1 %v506_v28, %s1334_s15 }
  0x9f   : > { %513 = vrot.lane.b32.xlu0 %v494_v30, %s1334_s15 }
  0xa2   : > { %536 = vrot.lane.b32.xlu1 %v1641_v59, %s1336_s28 }
  0xa3   : > { %528 = vrot.lane.b32.xlu0 %v1646_v58, %s1336_s28 }
  0xa6   : > { %538 = vrot.lane.b32.xlu1 %v1586_v8, %s1336_s28 }
  0xa7   : > { %530 = vrot.lane.b32.xlu0 %v1493_v52, %s1336_s28 }
  0xaa   : > { %564 = vrot.lane.b32.xlu1 %v449_v20, %s1337_s5 }
  0xab   : > { %556 = vrot.lane.b32.xlu0 %v401_v23, %s1337_s5 }
  0xae   : > { %566 = vrot.lane.b32.xlu1 %v1614_v38, %s1337_s5 }
  0xaf   : > { %558 = vrot.lane.b32.xlu0 %v1560_v51, %s1337_s5  ;;  %s1851_s5 = scalar_lea.sflag [#allocation5], %s203_s9 }
  0xb2   : > { %584 = vrot.lane.b32.xlu1 %v506_v28, %s1338_s6 }
  0xb3   : > { %576 = vrot.lane.b32.xlu0 %v494_v30, %s1338_s6 }
  0xb6   : > { %586 = vrot.lane.b32.xlu1 %v1601_v29, %s1338_s6 }
  0xb7   : > { %578 = vrot.lane.b32.xlu0 %v1516_v9, %s1338_s6  ;;  %s1238_s6 = scalar_lea.vmem %s1844_s25, 2048 }
  0xb8   : > { %p1239_p0 = scmp.ne.s32.totalorder %s1844_s25, %s1238_s6 }
  0xba   : > { %601 = vrot.lane.b32.xlu1 %v1586_v8, %s1339_s7  ;;  %p1240_p1 = pnand %p1239_p0, %p1423_p3 }
  0xbb   : > { %593 = vrot.lane.b32.xlu0 %v1493_v52, %s1339_s7 }
  0xbc   : > { %p1241_p2 = pneg %p1240_p1 }
  0xbe   : > { %603 = vrot.lane.b32.xlu1 %v1589_v13, %s1339_s7 }
  0xbf   : > { %595 = vrot.lane.b32.xlu0 %v1507_v0, %s1339_s7  ;;  %s1342_s7 = smov [#allocation4]  }
  0xc2   : > { %629 = vrot.lane.b32.xlu1 %v1614_v38, %s1340_s11 }
  0xc3   : > { %621 = vrot.lane.b32.xlu0 %v1560_v51, %s1340_s11 }
  0xc4   : > { %v516_v31 = vpop.permute.xlu1 %515 }
  0xc5   : > { %v508_v32 = vpop.permute.xlu0 %507 }
  0xc6   : > { %631 = vrot.lane.b32.xlu1 %v1622_v41, %s1340_s11 }
  0xc7   : > { %623 = vrot.lane.b32.xlu0 %v1557_v50, %s1340_s11  ;;  %s1242_s11 = sshll.u32 %s1342_s7, 4  ;;  %s1243_s11 = int_to_ptr.vmem [resolvable:$false] %s1242_s11 }
  0xc8   : > { %v518_v8 = vpop.permute.xlu1 %517  ;;  %p1245_p4 = scmp.lt.s32.totalorder %s1844_s25, %s1243_s11 }
  0xc9   : > { %v1732_v33 = vpop.permute.xlu0 %509 }
  0xca   : > { %649 = vrot.lane.b32.xlu1 %v1601_v29, %s1341_s12 }
  0xcb   : > { %641 = vrot.lane.b32.xlu0 %v1516_v9, %s1341_s12 }
  0xcc   : > { %v453_v13 = vpop.permute.xlu1 %452 }
  0xcd   : > { %v451_v34 = vpop.permute.xlu0 %450  ;;  %v657_v12 = vsel %vm653_vm3, %v1513_v7, %v453_v13 }
  0xce   : > { %651 = vrot.lane.b32.xlu1 %v1617_v40, %s1341_s12  ;;  %v655_v56 = vsel %vm653_vm3, %v1500_v57, %v451_v34  ;;  %v674_v20 = vsel %vm670_vm4, %v657_v12, %v1732_v33 }
  0xcf   : > { %643 = vrot.lane.b32.xlu0 %v1527_v17, %s1341_s12  ;;  %v672_v62 = vsel %vm670_vm4, %v655_v56, %v508_v32  ;;  %s1244_s12 = scalar_lea.vmem %s1243_s11, 4096 }
  0xd0   : > { %v461_v51 = vpop.permute.xlu1 %460  ;;  %p1246_p5 = scmp.lt.s32.totalorder %s1244_s12, %s1238_s6 }
  0xd1   : > { %v459_v35 = vpop.permute.xlu0 %458  ;;  %v665_v5 = vsel %vm653_vm3, %v1507_v0, %v461_v51 }
  0xd2   : > { %v663_v17 = vsel %vm653_vm3, %v1493_v52, %v459_v35  ;;  %v682_v19 = vsel %vm670_vm4, %v665_v5, %v518_v8  ;;  %p1247_p6 = por %p1246_p5, %p1245_p4 }
  0xd3   : > { %v680_v60 = vsel %vm670_vm4, %v663_v17, %v516_v31 }
  0xd4   : > { %v533_v50 = vpop.permute.xlu1 %532  ;;  %p1248_p7 = pnand %p1247_p6, %p1241_p2 }
  0xd5   : > { %v525_v36 = vpop.permute.xlu0 %524  ;;  %v697_v61 = vsel %vm687_vm5, %v680_v60, %v533_v50 }
  0xd6   : > { %v689_v63 = vsel %vm687_vm5, %v672_v62, %v525_v36 }
  0xd8   : > { %v535_v37 = vpop.permute.xlu1 %534 }
  0xd9   : > { %v527_v38 = vpop.permute.xlu0 %526  ;;  %v699_v0 = vsel %vm687_vm5, %v682_v19, %v535_v37 }
  0xda   : > { %v691_v7 = vsel %vm687_vm5, %v674_v20, %v527_v38 }
  0xdc   : > { %v561_v39 = vpop.permute.xlu1 %560 }
  0xdd   : > { %v553_v41 = vpop.permute.xlu0 %552  ;;  %v714_v52 = vsel %vm704_vm6, %v697_v61, %v561_v39 }
  0xde   : > { %v706_v57 = vsel %vm704_vm6, %v689_v63, %v553_v41 }
  0xe0   : > { %v563_v29 = vpop.permute.xlu1 %562 }
  0xe1   : > { %v555_v42 = vpop.permute.xlu0 %554  ;;  %v716_v23 = vsel %vm704_vm6, %v699_v0, %v563_v29 }
  0xe2   : > { %v708_v25 = vsel %vm704_vm6, %v691_v7, %v555_v42 }
  0xe4   : > { %v581_v43 = vpop.permute.xlu1 %580 }
  0xe5   : > { %v573_v9 = vpop.permute.xlu0 %572  ;;  %v731_v2 = vsel %vm721_vm7, %v714_v52, %v581_v43 }
  0xe6   : > { %v723_v3 = vsel %vm721_vm7, %v706_v57, %v573_v9 }
  0xe8   : > { %v583_v44 = vpop.permute.xlu1 %582 }
  0xe9   : > { %v575_v45 = vpop.permute.xlu0 %574  ;;  %v733_v26 = vsel %vm721_vm7, %v716_v23, %v583_v44 }
  0xea   : > { %v725_v27 = vsel %vm721_vm7, %v708_v25, %v575_v45 }
  0xec   : > { %v598_v46 = vpop.permute.xlu1 %597 }
  0xed   : > { %v590_v49 = vpop.permute.xlu0 %589  ;;  %v748_v4 = vsel %vm738_vm8, %v731_v2, %v598_v46 }
  0xee   : > { %v740_v6 = vsel %vm738_vm8, %v723_v3, %v590_v49 }
  0xf0   : > { %v600_v40 = vpop.permute.xlu1 %599 }
  0xf1   : > { %v592_v54 = vpop.permute.xlu0 %591  ;;  %v750_v28 = vsel %vm738_vm8, %v733_v26, %v600_v40 }
  0xf2   : > { %v742_v30 = vsel %vm738_vm8, %v725_v27, %v592_v54 }
  0xf4   : > { %v626_v55 = vpop.permute.xlu1 %625 }
  0xf5   : > { %v618_v53 = vpop.permute.xlu0 %617  ;;  %v765_v10 = vsel %vm755_vm9, %v748_v4, %v626_v55 }
  0xf6   : > { %v757_v14 = vsel %vm755_vm9, %v740_v6, %v618_v53 }
  0xf8   : > { %v628_v21 = vpop.permute.xlu1 %627 }
  0xf9   : > { %v620_v1 = vpop.permute.xlu0 %619  ;;  %v767_v31 = vsel %vm755_vm9, %v750_v28, %v628_v21 }
  0xfa   : > { %v759_v8 = vsel %vm755_vm9, %v742_v30, %v620_v1 }
  0xfc   : > { %v646_v11 = vpop.permute.xlu1 %645 }
  0xfd   : > { %v638_v15 = vpop.permute.xlu0 %637  ;;  %v782_v16 = vsel %vm772_vm10, %v765_v10, %v646_v11 }
  0xfe   : > { %v774_v18 = vsel %vm772_vm10, %v757_v14, %v638_v15  ;;  %1118 = vmatprep.mubr.msk.bf16.mxu1 %vm809_vm11, %v782_v16 }
  0xff   : > { %1110 = vmatprep.mubr.msk.bf16.mxu0 %vm809_vm11, %v774_v18 }
 0x100   : > { %v463_v22 = vpop.permute.xlu1 %462 }
 0x101   : > { %v455_v24 = vpop.permute.xlu0 %454  ;;  %v667_v62 = vsel %vm653_vm3, %v1550_v47, %v463_v22 }
 0x102   : > { %v659_v21 = vsel %vm653_vm3, %v1552_v48, %v455_v24 }
 0x104   : > { %v648_v32 = vpop.permute.xlu1 %647 }
 0x105   : > { %v784_v33 = vsel %vm772_vm10, %v767_v31, %v648_v32  ;;  %v640_v13 = vpop.permute.xlu0 %639 }
 0x106   : > { %v776_v34 = vsel %vm772_vm10, %v759_v8, %v640_v13  ;;  %1119 = vmatmul.mubr.msk.bf16.vlgmr.msra.gmra.mrb[0].mxu1 %vm809_vm11, %v784_v33 }
 0x107   : > { %1111 = vmatmul.mubr.msk.bf16.vlgmr.msra.gmra.mrb[0].mxu0 %vm809_vm11, %v776_v34 }
 0x108   : > { %v465_v51 = vpop.permute.xlu1 %464 }
 0x109   : > { %v457_v35 = vpop.permute.xlu0 %456  ;;  %v669_v5 = vsel %vm653_vm3, %v1641_v59, %v465_v51 }
 0x10a   : > { %v661_v48 = vsel %vm653_vm3, %v1646_v58, %v457_v35 }
 0x10c   : > { %v520_v50 = vpop.permute.xlu1 %519 }
 0x10d   : > { %v512_v36 = vpop.permute.xlu0 %511  ;;  %v684_v63 = vsel %vm670_vm4, %v667_v62, %v520_v50 }
 0x10e   : > { %v676_v52 = vsel %vm670_vm4, %v659_v21, %v512_v36 }
 0x110   : > { %v522_v37 = vpop.permute.xlu1 %521 }
 0x111   : > { %v514_v38 = vpop.permute.xlu0 %513  ;;  %v686_v10 = vsel %vm670_vm4, %v669_v5, %v522_v37 }
 0x112   : > { %v678_v14 = vsel %vm670_vm4, %v661_v48, %v514_v38 }
 0x114   : > { %v537_v39 = vpop.permute.xlu1 %536 }
 0x115   : > { %v529_v41 = vpop.permute.xlu0 %528  ;;  %v701_v1 = vsel %vm687_vm5, %v684_v63, %v537_v39 }
 0x116   : > { %v693_v2 = vsel %vm687_vm5, %v676_v52, %v529_v41 }
 0x118   : > { %v539_v29 = vpop.permute.xlu1 %538 }
 0x119   : > { %v531_v42 = vpop.permute.xlu0 %530  ;;  %v703_v15 = vsel %vm687_vm5, %v686_v10, %v539_v29 }
 0x11a   : > { %v695_v19 = vsel %vm687_vm5, %v678_v14, %v531_v42 }
 0x11c   : > { %v565_v43 = vpop.permute.xlu1 %564 }
 0x11d   : > { %v557_v9 = vpop.permute.xlu0 %556  ;;  %v718_v3 = vsel %vm704_vm6, %v701_v1, %v565_v43 }
 0x11e   : > { %v710_v47 = vsel %vm704_vm6, %v693_v2, %v557_v9 }
 0x120   : > { %v567_v44 = vpop.permute.xlu1 %566 }
 0x121   : > { %v559_v45 = vpop.permute.xlu0 %558  ;;  %v720_v0 = vsel %vm704_vm6, %v703_v15, %v567_v44 }
 0x122   : > { %v712_v7 = vsel %vm704_vm6, %v695_v19, %v559_v45 }
 0x124   : > { %v585_v46 = vpop.permute.xlu1 %584 }
 0x125   : > { %v577_v49 = vpop.permute.xlu0 %576  ;;  %v735_v6 = vsel %vm721_vm7, %v718_v3, %v585_v46 }
 0x126   : > { %v727_v11 = vsel %vm721_vm7, %v710_v47, %v577_v49 }
 0x128   : > { %v587_v40 = vpop.permute.xlu1 %586 }
 0x129   : > { %v579_v54 = vpop.permute.xlu0 %578  ;;  %v737_v23 = vsel %vm721_vm7, %v720_v0, %v587_v40 }
 0x12a   : > { %v729_v25 = vsel %vm721_vm7, %v712_v7, %v579_v54 }
 0x12c   : > { %v602_v17 = vpop.permute.xlu1 %601 }
 0x12d   : > { %v594_v55 = vpop.permute.xlu0 %593  ;;  %v752_v12 = vsel %vm738_vm8, %v735_v6, %v602_v17 }
 0x12e   : > { %v744_v16 = vsel %vm738_vm8, %v727_v11, %v594_v55 }
 0x130   : > { %v604_v56 = vpop.permute.xlu1 %603 }
 0x131   : > { %v596_v53 = vpop.permute.xlu0 %595  ;;  %v754_v26 = vsel %vm738_vm8, %v737_v23, %v604_v56 }
 0x132   : > { %v746_v27 = vsel %vm738_vm8, %v729_v25, %v596_v53 }
 0x134   : > { %v630_v60 = vpop.permute.xlu1 %629 }
 0x135   : > { %v622_v61 = vpop.permute.xlu0 %621  ;;  %v769_v59 = vsel %vm755_vm9, %v752_v12, %v630_v60 }
 0x136   : > { %v761_v58 = vsel %vm755_vm9, %v744_v16, %v622_v61 }
 0x138   : > { %v632_v57 = vpop.permute.xlu1 %631 }
 0x139   : > { %v624_v4 = vpop.permute.xlu0 %623  ;;  %v771_v28 = vsel %vm755_vm9, %v754_v26, %v632_v57 }
 0x13a   : > { %v763_v31 = vsel %vm755_vm9, %v746_v27, %v624_v4 }
 0x13c   : > { %v650_v18 = vpop.permute.xlu1 %649 }
 0x13d   : > { %v786_v20 = vsel %vm772_vm10, %v769_v59, %v650_v18  ;;  %v642_v22 = vpop.permute.xlu0 %641 }
 0x13e   : > { %v778_v24 = vsel %vm772_vm10, %v761_v58, %v642_v22  ;;  %1122 = vmatprep.mubr.msk.bf16.mxu1 %vm809_vm11, %v786_v20 }
 0x13f   : > { %1114 = vmatprep.mubr.msk.bf16.mxu0 %vm809_vm11, %v778_v24 }
 0x140   : > { %v652_v30 = vpop.permute.xlu1 %651 }
 0x141   : > { %v788_v32 = vsel %vm772_vm10, %v771_v28, %v652_v30  ;;  %v644_v8 = vpop.permute.xlu0 %643 }
 0x142   : > { %v780_v33 = vsel %vm772_vm10, %v763_v31, %v644_v8  ;;  %1123 = vmatmul.mubr.msk.bf16.gmra.mrb[4].mxu1 %vm809_vm11, %v788_v32 }
 0x143   : > { %1115 = vmatmul.mubr.msk.bf16.gmra.mrb[4].mxu0 %vm809_vm11, %v780_v33 }
 0x1d9   : > { %v1120_v13 = vpop.f32.mrb[0].mxu1 }
 0x1da   : > { %v1112_v34 = vpop.f32.mrb[0].mxu0  ;;  %937 = vst [vmem:[%s1453_s16 + $0x50] sm:$0xff] %v1120_v13  ;;  %v896_v51 = vpop.f32.mrb[1].mxu1 }
 0x1db   : > { %929 = vst [vmem:[%s1453_s16 + $0x10] sm:$0xff] %v1112_v34  ;;  %v864_v35 = vpop.f32.mrb[1].mxu0  ;;  %935 = vst [vmem:[%s1453_s16 + $0x40] sm:$0xff] %v896_v51  ;;  %v1121_v50 = vpop.f32.mrb[2].mxu1 }
 0x1dc   : > { %927 = vst [vmem:[%s1453_s16] sm:$0xff] %v864_v35  ;;  %v1113_v36 = vpop.f32.mrb[2].mxu0  ;;  %938 = vst [vmem:[%s1453_s16 + $0x58] sm:$0xff] %v1121_v50  ;;  %v899_v37 = vpop.f32.mrb[3].mxu1 }
 0x1dd   : > { %930 = vst [vmem:[%s1453_s16 + $0x18] sm:$0xff] %v1113_v36  ;;  %v867_v38 = vpop.f32.mrb[3].mxu0  ;;  %936 = vst [vmem:[%s1453_s16 + $0x48] sm:$0xff] %v899_v37 }
 0x1de   : > { %928 = vst [vmem:[%s1453_s16 + $0x8] sm:$0xff] %v867_v38 }
 0x215   : > { %v1124_v39 = vpop.f32.mrb[4].mxu1 }
 0x216   : > { %v1116_v41 = vpop.f32.mrb[4].mxu0  ;;  %941 = vst [vmem:[%s1453_s16 + $0x70] sm:$0xff] %v1124_v39  ;;  %v912_v29 = vpop.f32.mrb[5].mxu1 }
 0x217   : > { %933 = vst [vmem:[%s1453_s16 + $0x30] sm:$0xff] %v1116_v41  ;;  %v880_v42 = vpop.f32.mrb[5].mxu0  ;;  %939 = vst [vmem:[%s1453_s16 + $0x60] sm:$0xff] %v912_v29  ;;  %v1125_v43 = vpop.f32.mrb[6].mxu1 }
 0x218   : > { %931 = vst [vmem:[%s1453_s16 + $0x20] sm:$0xff] %v880_v42  ;;  %v1117_v9 = vpop.f32.mrb[6].mxu0  ;;  %942 = vst [vmem:[%s1453_s16 + $0x78] sm:$0xff] %v1125_v43  ;;  %v915_v44 = vpop.f32.mrb[7].mxu1 }
 0x219   : > { %934 = vst [vmem:[%s1453_s16 + $0x38] sm:$0xff] %v1117_v9  ;;  %v883_v45 = vpop.f32.mrb[7].mxu0  ;;  %940 = vst [vmem:[%s1453_s16 + $0x68] sm:$0xff] %v915_v44 }
 0x21a   : > { %932 = vst [vmem:[%s1453_s16 + $0x28] sm:$0xff] %v883_v45 }
 0x21b   : > { %1251 = shalt.err (!%p1248_p7)
}
 0x21c   : > { %s1252_s9 = scalar_lea.hbm %s1840_s21, 2048  ;;  %s1256_s10 = scalar_lea.hbm %s1908_s4, 8192 }
 0x21d   : > { %p1253_p9 = scmp.ne.s32.totalorder %s1840_s21, %s1252_s9  ;;  %p1257_p12 = scmp.lt.u32.totalorder %s1840_s21, %s1908_s4 }
 0x21e   : > { %p1258_p13 = scmp.lt.u32.totalorder %s1256_s10, %s1252_s9  ;;  %p1260_p1 = scmp.lt.u32.totalorder %s1252_s9, %s1840_s21 }
 0x21f   : > { %p1254_p10 = pnand %p1253_p9, %p1423_p3 }
 0x220   : > { %p1259_p0 = por %p1258_p13, %p1257_p12 }
 0x221   : > { %p1255_p11 = pneg %p1254_p10 }
 0x222   : > { %p1261_p2 = por %p1260_p1, %p1259_p0 }
 0x224   : > { %p1262_p4 = pnand %p1261_p2, %p1255_p11 }
 0x226   : > { %1265 = shalt.err (!%p1262_p4)
}
 0x227   : > { %s1343_s28 = smov 128  }
 0x228   : > { %1135 = dma.vmem_to_hbm [thread:$0]  (%p1423_p3), %s1844_s25, 2048, %s1840_s21, %s1851_s5, %s1343_s28, %s1343_s28, %s1334_s15  }
 0x229 PF: > { %p1141_p5 = scmp.ge.s32.totalorder %s1332_s24, 2  ;;  %s975_s20 = sand.u32 1, %s1304_s17  }
 0x22a   : > { %s976_s6 = scalar_lea.sflag [#allocation5], %s975_s20 }
 0x22b   : > { %p1138_p6 = pnand %p1141_p5, %p1432_p8 }
 0x22d   : > { %1299 = dma.done.wait (!%p1138_p6), %s976_s6, 2048  }
 0x22e   : > { %1301 = vsyncadd (!%p1138_p6), %s976_s6, 4294965248  ;;  %s18_s24 = sadd.s32 1, %s1332_s24   ;;  %s1911_s17 = smov %s1308_s18 }
 0x22f   : > { %p15_p7 = scmp.ge.s32.totalorder %s18_s24, 6   ;;  %s1912_s18 = smov %s1312_s19 }
 0x230   : > { %s1913_s19 = smov %s1441_s8  ;;  %s1914_s20 = smov %s1324_s22 }
 0x231   : > { %s1915_s21 = smov %s1328_s23  ;;  %s1916_s22 = smov %s1919_s26 }
 0x232   : > { %s1917_s23 = smov %s1923_s27  ;;  %17 = sbr.rel (!%p15_p7) target bundleno = 7 (0x7), region = 76 }
 0x239   :  { %981 = vsyncpa [#allocation5], 1 }
 0x23a   :  { %983 = vsyncpa [#allocation5 + $0x1], 1 }

</bundles_post_ra>
